<compile_context>
chip_gen: v6e
topology: v6e:2x2x1
jax: 0.10.0
libtpu: 0.0.40
codegen_flags: <defaults>
</compile_context>

<pallas_src>
import functools
import math

import jax
import jax.numpy as jnp
from jax.experimental import pallas as pl
from jax.experimental.pallas import tpu as pltpu


_LOG_CLAMP = -100.0  # PyTorch nn.BCELoss clamps its log terms at -100.


def _bce_elem(p, t):
    logp = jnp.maximum(jnp.log(p), _LOG_CLAMP)
    log1mp = jnp.maximum(jnp.log(1.0 - p), _LOG_CLAMP)
    return -(t * logp + (1.0 - t) * log1mp)


def _yolo_loss_kernel(pred_ref, targ_ref, mask_ref, acc_ref):
    """Accumulates per-tile partial sums into a small dense resident block.

    pred_ref / targ_ref : (D, R, 128) channel-major tiles (dense (R,128) slab
                          per channel, full vreg utilisation).
    mask_ref            : (2, R, 128) -> row 0 objmask, row 1 noobjmask.
    acc_ref (output)    : (6, 8, 128) resident accumulator per parallel shard:
        0: loc (bce_x + bce_y + mse_w + mse_h, obj-masked)
        1: cls (obj-masked)          2: conf bce (obj-masked)
        3: conf bce (noobj-masked)   4: sum(objmask)   5: sum(noobjmask)
    """
    j = pl.program_id(1)

    @pl.when(j == 0)
    def _init():
        acc_ref[...] = jnp.zeros_like(acc_ref)

    d, r, _ = pred_ref.shape

    objm = mask_ref[0]                       # (R, 128)
    noobjm = mask_ref[1]                     # (R, 128)
    # Keep the `== 1` selection semantics of the reference (masks may be
    # non-binary floats: selection is ==1, denominators are float sums).
    obj = (objm == 1.0).astype(jnp.float32)
    noobj = (noobjm == 1.0).astype(jnp.float32)

    # x, y -> BCE(pred, targ);  w, h -> MSE(pred, targ)
    loc = _bce_elem(pred_ref[0], targ_ref[0]) + _bce_elem(pred_ref[1], targ_ref[1])
    dw = pred_ref[2] - targ_ref[2]
    dh = pred_ref[3] - targ_ref[3]
    loc = loc + dw * dw + dh * dh

    # conf -> BCE(conf, objmask): log pair shared between obj & noobj buckets.
    conf = pred_ref[4]
    logc = jnp.maximum(jnp.log(conf), _LOG_CLAMP)
    log1mc = jnp.maximum(jnp.log(1.0 - conf), _LOG_CLAMP)
    bce_conf = -(objm * logc + (1.0 - objm) * log1mc)

    # cls channels -> BCE(pred, targ), summed over classes.
    cls = jnp.zeros_like(loc)
    for c in range(5, d):
        cls = cls + _bce_elem(pred_ref[c], targ_ref[c])

    def fold(x):
        # (R, 128) -> (8, 128): sublane-group sum (free reshape + VPU adds).
        return jnp.sum(x.reshape(r // 8, 8, 128), axis=0)

    acc_ref[0] += fold(obj * loc)
    acc_ref[1] += fold(obj * cls)
    acc_ref[2] += fold(obj * bce_conf)
    acc_ref[3] += fold(noobj * bce_conf)
    acc_ref[4] += fold(objm)
    acc_ref[5] += fold(noobjm)


def _round_up(x, m):
    return (x + m - 1) // m * m


def _to_channel_major(x, n, n_pad, nb_pad, pad_value):
    """[.., D] -> (D, NB, 128) channel-major, padded rows hold `pad_value`."""
    d = x.shape[-1]
    x = x.reshape(n, d).astype(jnp.float32).T          # (D, N): one fused HBM pass
    if n_pad > n:
        x = jnp.pad(x, ((0, 0), (0, n_pad - n)), constant_values=pad_value)
    return x.reshape(d, nb_pad, 128)


@functools.partial(jax.jit, static_argnames=("tile_n", "num_parallel"))
def yolov3_loss(prediction, targets, masks, *, tile_n=32768, num_parallel=2):
    d = prediction.shape[-1]
    n = math.prod(prediction.shape[:-1])

    # Tiling: R rows-of-128 per tile.  Pad NB so par * inner * R == NB exactly
    # -> no clamped tiles, no in-kernel tail masking.
    nb1 = pl.cdiv(n, 128)
    r_cap = max(8, (tile_n // 128) // 8 * 8)
    if nb1 <= r_cap:
        r = _round_up(nb1, 8)
        total = 1
    else:
        r = r_cap
        total = pl.cdiv(nb1, r)
    par = max(1, min(num_parallel, total))    # 2-way split for v7x megacore
    inner = pl.cdiv(total, par)
    nb_pad = par * inner * r
    n_pad = nb_pad * 128

    # pred padded with 0.5 (keeps log() finite), targ/masks with 0 (padded rows
    # contribute nothing to any bucket, including the mask sums).
    pred = _to_channel_major(prediction, n, n_pad, nb_pad, 0.5)   # (D, NB, 128)
    targ = _to_channel_major(targets, n, n_pad, nb_pad, 0.0)      # (D, NB, 128)
    mask = _to_channel_major(masks, n, n_pad, nb_pad, 0.0)        # (2, NB, 128)

    partials = pl.pallas_call(
        _yolo_loss_kernel,
        out_shape=jax.ShapeDtypeStruct((par * 6, 8, 128), jnp.float32),
        grid_spec=pltpu.PrefetchScalarGridSpec(
            num_scalar_prefetch=0,
            grid=(par, inner),
            in_specs=[
                pl.BlockSpec((d, r, 128), lambda p, j: (0, p * inner + j, 0)),
                pl.BlockSpec((d, r, 128), lambda p, j: (0, p * inner + j, 0)),
                pl.BlockSpec((2, r, 128), lambda p, j: (0, p * inner + j, 0)),
            ],
            out_specs=pl.BlockSpec((6, 8, 128), lambda p, j: (p, 0, 0)),
        ),
        compiler_params=pltpu.CompilerParams(
            dimension_semantics=("parallel", "arbitrary")),
    )(pred, targ, mask)

    # Single small cross-lane reduction + a handful of scalar ops.
    sums = jnp.sum(partials.reshape(par, 6, 8, 128), axis=(0, 2, 3))   # (6,)
    n_obj = sums[4]
    n_noobj = sums[5]
    loss_loc = sums[0] / n_obj
    loss_cls = sums[1] / n_obj
    loss_obj = sums[2] / n_obj
    loss_noobj = sums[3] / n_noobj
    loss = loss_loc * 2.5 + loss_obj + loss_noobj * 0.5 + loss_cls
    return loss_loc, loss_cls, loss


def _reference_loss(prediction, targets, masks):
    """Pure-JAX reference reproducing the PyTorch forward exactly."""
    objmask = masks[..., 0]
    noobjmask = masks[..., 1]
    obj = (objmask == 1.0).astype(jnp.float32)
    noobj = (noobjmask == 1.0).astype(jnp.float32)
    p, t = prediction, targets

    n_obj = jnp.sum(objmask)
    n_noobj = jnp.sum(noobjmask)
    loss_x = jnp.sum(obj * _bce_elem(p[..., 0], t[..., 0])) / n_obj
    loss_y = jnp.sum(obj * _bce_elem(p[..., 1], t[..., 1])) / n_obj
    loss_w = jnp.sum(obj * (p[..., 2] - t[..., 2]) ** 2) / n_obj
    loss_h = jnp.sum(obj * (p[..., 3] - t[..., 3]) ** 2) / n_obj
    loss_obj = jnp.sum(obj * _bce_elem(p[..., 4], objmask)) / n_obj
    loss_noobj = jnp.sum(noobj * _bce_elem(p[..., 4], objmask)) / n_noobj
    loss_cls = jnp.sum(obj[..., None] * _bce_elem(p[..., 5:], t[..., 5:])) / n_obj
    loss_loc = loss_x + loss_y + loss_w + loss_h
    loss = loss_loc * 2.5 + loss_obj + loss_noobj * 0.5 + loss_cls
    return loss_loc, loss_cls, loss


if __name__ == "__main__":
    key = jax.random.PRNGKey(0)
    B, A, G, C = 2, 3, 8, 4          # batch, anchors, grid, num_classes
    D = 5 + C
    k1, k2, k3, k4, k5 = jax.random.split(key, 5)

    # prediction in (0,1) (post-sigmoid, as required by BCELoss)
    prediction = jax.nn.sigmoid(jax.random.normal(k1, (B, A, G, G, D), jnp.float32))
    txy = jax.random.uniform(k2, (B, A, G, G, 2), jnp.float32)
    twh = jax.random.normal(k3, (B, A, G, G, 2), jnp.float32)
    tconf = jnp.zeros((B, A, G, G, 1), jnp.float32)
    tcls = (jax.random.uniform(k4, (B, A, G, G, C)) < 0.25).astype(jnp.float32)
    targets = jnp.concatenate([txy, twh, tconf, tcls], axis=-1)

    objmask = (jax.random.uniform(k5, (B, A, G, G)) < 0.2).astype(jnp.float32)
    noobjmask = 1.0 - objmask
    masks = jnp.stack([objmask, noobjmask], axis=-1)

    loss_loc, loss_cls, loss = yolov3_loss(prediction, targets, masks)
    jax.block_until_ready(loss)

    r_loc, r_cls, r_loss = _reference_loss(prediction, targets, masks)
    assert jnp.allclose(loss_loc, r_loc, rtol=1e-4, atol=1e-4)
    assert jnp.allclose(loss_cls, r_cls, rtol=1e-4, atol=1e-4)
    assert jnp.allclose(loss, r_loss, rtol=1e-4, atol=1e-4)

    print("KERNEL_OK")
</pallas_src>

<mosaic_0001>
module attributes {stable_mosaic.version = 11 : i64} {
  func.func @_yolo_loss_kernel(%arg0: i32, %arg1: i32, %arg2: memref<9x8x128xf32, #tpu.memory_space<vmem>>, %arg3: memref<9x8x128xf32, #tpu.memory_space<vmem>>, %arg4: memref<2x8x128xf32, #tpu.memory_space<vmem>>, %arg5: memref<6x8x128xf32, #tpu.memory_space<vmem>>) attributes {dimension_semantics = [#tpu.dimension_semantics<parallel>, #tpu.dimension_semantics<arbitrary>], iteration_bounds = array<i64: 1, 1>, scalar_prefetch = 0 : i64, scratch_operands = 0 : i64, tpu.core_type = #tpu.core_type<tc>, window_params = [{transform_indices = @transform_0, window_bounds = array<i64: 9, 8, 128>}, {transform_indices = @transform_1, window_bounds = array<i64: 9, 8, 128>}, {transform_indices = @transform_2, window_bounds = array<i64: 2, 8, 128>}, {transform_indices = @transform_3, window_bounds = array<i64: 6, 8, 128>}]} {
    %c0_i32 = arith.constant 0 : i32
    %0 = arith.cmpi eq, %arg1, %c0_i32 : i32
    %1 = arith.extui %0 : i1 to i32
    %c0_i32_0 = arith.constant 0 : i32
    %2 = arith.cmpi ne, %1, %c0_i32_0 : i32
    scf.if %2 {
      %cst_128 = arith.constant 0.000000e+00 : f32
      %218 = vector.broadcast %cst_128 : f32 to vector<6x8x128xf32>
      %c0_129 = arith.constant 0 : index
      %c0_130 = arith.constant 0 : index
      %c0_131 = arith.constant 0 : index
      %219 = vector.load %arg5[%c0_129, %c0_130, %c0_131] : memref<6x8x128xf32, #tpu.memory_space<vmem>>, vector<6x8x128xf32>
      tpu.vector_store %arg5[%c0_129, %c0_130, %c0_131], %218 {strides = array<i32>} : memref<6x8x128xf32, #tpu.memory_space<vmem>>, vector<6x8x128xf32>,
    } else {
    }
    %c0 = arith.constant 0 : index
    %c0_1 = arith.constant 0 : index
    %c0_2 = arith.constant 0 : index
    %3 = vector.load %arg4[%c0, %c0_1, %c0_2] : memref<2x8x128xf32, #tpu.memory_space<vmem>>, vector<1x8x128xf32>
    %4 = vector.shape_cast %3 : vector<1x8x128xf32> to vector<8x128xf32>
    %c1 = arith.constant 1 : index
    %c0_3 = arith.constant 0 : index
    %c0_4 = arith.constant 0 : index
    %5 = vector.load %arg4[%c1, %c0_3, %c0_4] : memref<2x8x128xf32, #tpu.memory_space<vmem>>, vector<1x8x128xf32>
    %6 = vector.shape_cast %5 : vector<1x8x128xf32> to vector<8x128xf32>
    %cst = arith.constant 1.000000e+00 : f32
    %7 = vector.broadcast %cst : f32 to vector<8x128xf32>
    %8 = arith.cmpf oeq, %4, %7 : vector<8x128xf32>
    %9 = arith.extui %8 : vector<8x128xi1> to vector<8x128xi32>
    %10 = arith.sitofp %9 : vector<8x128xi32> to vector<8x128xf32>
    %cst_5 = arith.constant 1.000000e+00 : f32
    %11 = vector.broadcast %cst_5 : f32 to vector<8x128xf32>
    %12 = arith.cmpf oeq, %6, %11 : vector<8x128xf32>
    %13 = arith.extui %12 : vector<8x128xi1> to vector<8x128xi32>
    %14 = arith.sitofp %13 : vector<8x128xi32> to vector<8x128xf32>
    %c0_6 = arith.constant 0 : index
    %c0_7 = arith.constant 0 : index
    %c0_8 = arith.constant 0 : index
    %15 = vector.load %arg2[%c0_6, %c0_7, %c0_8] : memref<9x8x128xf32, #tpu.memory_space<vmem>>, vector<1x8x128xf32>
    %16 = vector.shape_cast %15 : vector<1x8x128xf32> to vector<8x128xf32>
    %c0_9 = arith.constant 0 : index
    %c0_10 = arith.constant 0 : index
    %c0_11 = arith.constant 0 : index
    %17 = vector.load %arg3[%c0_9, %c0_10, %c0_11] : memref<9x8x128xf32, #tpu.memory_space<vmem>>, vector<1x8x128xf32>
    %18 = vector.shape_cast %17 : vector<1x8x128xf32> to vector<8x128xf32>
    %19 = math.log %16 : vector<8x128xf32>
    %cst_12 = arith.constant -1.000000e+02 : f32
    %20 = vector.broadcast %cst_12 : f32 to vector<8x128xf32>
    %21 = arith.maximumf %19, %20 : vector<8x128xf32>
    %cst_13 = arith.constant 1.000000e+00 : f32
    %22 = vector.broadcast %cst_13 : f32 to vector<8x128xf32>
    %23 = arith.subf %22, %16 : vector<8x128xf32>
    %24 = math.log %23 : vector<8x128xf32>
    %cst_14 = arith.constant -1.000000e+02 : f32
    %25 = vector.broadcast %cst_14 : f32 to vector<8x128xf32>
    %26 = arith.maximumf %24, %25 : vector<8x128xf32>
    %27 = arith.mulf %18, %21 : vector<8x128xf32>
    %cst_15 = arith.constant 1.000000e+00 : f32
    %28 = vector.broadcast %cst_15 : f32 to vector<8x128xf32>
    %29 = arith.subf %28, %18 : vector<8x128xf32>
    %30 = arith.mulf %29, %26 : vector<8x128xf32>
    %31 = arith.addf %27, %30 : vector<8x128xf32>
    %cst_16 = arith.constant 0.000000e+00 : f32
    %32 = vector.broadcast %cst_16 : f32 to vector<8x128xf32>
    %33 = arith.subf %32, %31 : vector<8x128xf32>
    %c1_17 = arith.constant 1 : index
    %c0_18 = arith.constant 0 : index
    %c0_19 = arith.constant 0 : index
    %34 = vector.load %arg2[%c1_17, %c0_18, %c0_19] : memref<9x8x128xf32, #tpu.memory_space<vmem>>, vector<1x8x128xf32>
    %35 = vector.shape_cast %34 : vector<1x8x128xf32> to vector<8x128xf32>
    %c1_20 = arith.constant 1 : index
    %c0_21 = arith.constant 0 : index
    %c0_22 = arith.constant 0 : index
    %36 = vector.load %arg3[%c1_20, %c0_21, %c0_22] : memref<9x8x128xf32, #tpu.memory_space<vmem>>, vector<1x8x128xf32>
    %37 = vector.shape_cast %36 : vector<1x8x128xf32> to vector<8x128xf32>
    %38 = math.log %35 : vector<8x128xf32>
    %cst_23 = arith.constant -1.000000e+02 : f32
    %39 = vector.broadcast %cst_23 : f32 to vector<8x128xf32>
    %40 = arith.maximumf %38, %39 : vector<8x128xf32>
    %cst_24 = arith.constant 1.000000e+00 : f32
    %41 = vector.broadcast %cst_24 : f32 to vector<8x128xf32>
    %42 = arith.subf %41, %35 : vector<8x128xf32>
    %43 = math.log %42 : vector<8x128xf32>
    %cst_25 = arith.constant -1.000000e+02 : f32
    %44 = vector.broadcast %cst_25 : f32 to vector<8x128xf32>
    %45 = arith.maximumf %43, %44 : vector<8x128xf32>
    %46 = arith.mulf %37, %40 : vector<8x128xf32>
    %cst_26 = arith.constant 1.000000e+00 : f32
    %47 = vector.broadcast %cst_26 : f32 to vector<8x128xf32>
    %48 = arith.subf %47, %37 : vector<8x128xf32>
    %49 = arith.mulf %48, %45 : vector<8x128xf32>
    %50 = arith.addf %46, %49 : vector<8x128xf32>
    %cst_27 = arith.constant 0.000000e+00 : f32
    %51 = vector.broadcast %cst_27 : f32 to vector<8x128xf32>
    %52 = arith.subf %51, %50 : vector<8x128xf32>
    %53 = arith.addf %33, %52 : vector<8x128xf32>
    %c2 = arith.constant 2 : index
    %c0_28 = arith.constant 0 : index
    %c0_29 = arith.constant 0 : index
    %54 = vector.load %arg2[%c2, %c0_28, %c0_29] : memref<9x8x128xf32, #tpu.memory_space<vmem>>, vector<1x8x128xf32>
    %55 = vector.shape_cast %54 : vector<1x8x128xf32> to vector<8x128xf32>
    %c2_30 = arith.constant 2 : index
    %c0_31 = arith.constant 0 : index
    %c0_32 = arith.constant 0 : index
    %56 = vector.load %arg3[%c2_30, %c0_31, %c0_32] : memref<9x8x128xf32, #tpu.memory_space<vmem>>, vector<1x8x128xf32>
    %57 = vector.shape_cast %56 : vector<1x8x128xf32> to vector<8x128xf32>
    %58 = arith.subf %55, %57 : vector<8x128xf32>
    %c3 = arith.constant 3 : index
    %c0_33 = arith.constant 0 : index
    %c0_34 = arith.constant 0 : index
    %59 = vector.load %arg2[%c3, %c0_33, %c0_34] : memref<9x8x128xf32, #tpu.memory_space<vmem>>, vector<1x8x128xf32>
    %60 = vector.shape_cast %59 : vector<1x8x128xf32> to vector<8x128xf32>
    %c3_35 = arith.constant 3 : index
    %c0_36 = arith.constant 0 : index
    %c0_37 = arith.constant 0 : index
    %61 = vector.load %arg3[%c3_35, %c0_36, %c0_37] : memref<9x8x128xf32, #tpu.memory_space<vmem>>, vector<1x8x128xf32>
    %62 = vector.shape_cast %61 : vector<1x8x128xf32> to vector<8x128xf32>
    %63 = arith.subf %60, %62 : vector<8x128xf32>
    %64 = arith.mulf %58, %58 : vector<8x128xf32>
    %65 = arith.addf %53, %64 : vector<8x128xf32>
    %66 = arith.mulf %63, %63 : vector<8x128xf32>
    %67 = arith.addf %65, %66 : vector<8x128xf32>
    %c4 = arith.constant 4 : index
    %c0_38 = arith.constant 0 : index
    %c0_39 = arith.constant 0 : index
    %68 = vector.load %arg2[%c4, %c0_38, %c0_39] : memref<9x8x128xf32, #tpu.memory_space<vmem>>, vector<1x8x128xf32>
    %69 = vector.shape_cast %68 : vector<1x8x128xf32> to vector<8x128xf32>
    %70 = math.log %69 : vector<8x128xf32>
    %cst_40 = arith.constant -1.000000e+02 : f32
    %71 = vector.broadcast %cst_40 : f32 to vector<8x128xf32>
    %72 = arith.maximumf %70, %71 : vector<8x128xf32>
    %cst_41 = arith.constant 1.000000e+00 : f32
    %73 = vector.broadcast %cst_41 : f32 to vector<8x128xf32>
    %74 = arith.subf %73, %69 : vector<8x128xf32>
    %75 = math.log %74 : vector<8x128xf32>
    %cst_42 = arith.constant -1.000000e+02 : f32
    %76 = vector.broadcast %cst_42 : f32 to vector<8x128xf32>
    %77 = arith.maximumf %75, %76 : vector<8x128xf32>
    %78 = arith.mulf %4, %72 : vector<8x128xf32>
    %cst_43 = arith.constant 1.000000e+00 : f32
    %79 = vector.broadcast %cst_43 : f32 to vector<8x128xf32>
    %80 = arith.subf %79, %4 : vector<8x128xf32>
    %81 = arith.mulf %80, %77 : vector<8x128xf32>
    %82 = arith.addf %78, %81 : vector<8x128xf32>
    %cst_44 = arith.constant 0.000000e+00 : f32
    %83 = vector.broadcast %cst_44 : f32 to vector<8x128xf32>
    %84 = arith.subf %83, %82 : vector<8x128xf32>
    %cst_45 = arith.constant 0.000000e+00 : f32
    %85 = vector.broadcast %cst_45 : f32 to vector<8x128xf32>
    %c5 = arith.constant 5 : index
    %c0_46 = arith.constant 0 : index
    %c0_47 = arith.constant 0 : index
    %86 = vector.load %arg2[%c5, %c0_46, %c0_47] : memref<9x8x128xf32, #tpu.memory_space<vmem>>, vector<1x8x128xf32>
    %87 = vector.shape_cast %86 : vector<1x8x128xf32> to vector<8x128xf32>
    %c5_48 = arith.constant 5 : index
    %c0_49 = arith.constant 0 : index
    %c0_50 = arith.constant 0 : index
    %88 = vector.load %arg3[%c5_48, %c0_49, %c0_50] : memref<9x8x128xf32, #tpu.memory_space<vmem>>, vector<1x8x128xf32>
    %89 = vector.shape_cast %88 : vector<1x8x128xf32> to vector<8x128xf32>
    %90 = math.log %87 : vector<8x128xf32>
    %cst_51 = arith.constant -1.000000e+02 : f32
    %91 = vector.broadcast %cst_51 : f32 to vector<8x128xf32>
    %92 = arith.maximumf %90, %91 : vector<8x128xf32>
    %cst_52 = arith.constant 1.000000e+00 : f32
    %93 = vector.broadcast %cst_52 : f32 to vector<8x128xf32>
    %94 = arith.subf %93, %87 : vector<8x128xf32>
    %95 = math.log %94 : vector<8x128xf32>
    %cst_53 = arith.constant -1.000000e+02 : f32
    %96 = vector.broadcast %cst_53 : f32 to vector<8x128xf32>
    %97 = arith.maximumf %95, %96 : vector<8x128xf32>
    %98 = arith.mulf %89, %92 : vector<8x128xf32>
    %cst_54 = arith.constant 1.000000e+00 : f32
    %99 = vector.broadcast %cst_54 : f32 to vector<8x128xf32>
    %100 = arith.subf %99, %89 : vector<8x128xf32>
    %101 = arith.mulf %100, %97 : vector<8x128xf32>
    %102 = arith.addf %98, %101 : vector<8x128xf32>
    %cst_55 = arith.constant 0.000000e+00 : f32
    %103 = vector.broadcast %cst_55 : f32 to vector<8x128xf32>
    %104 = arith.subf %103, %102 : vector<8x128xf32>
    %105 = arith.addf %85, %104 : vector<8x128xf32>
    %c6 = arith.constant 6 : index
    %c0_56 = arith.constant 0 : index
    %c0_57 = arith.constant 0 : index
    %106 = vector.load %arg2[%c6, %c0_56, %c0_57] : memref<9x8x128xf32, #tpu.memory_space<vmem>>, vector<1x8x128xf32>
    %107 = vector.shape_cast %106 : vector<1x8x128xf32> to vector<8x128xf32>
    %c6_58 = arith.constant 6 : index
    %c0_59 = arith.constant 0 : index
    %c0_60 = arith.constant 0 : index
    %108 = vector.load %arg3[%c6_58, %c0_59, %c0_60] : memref<9x8x128xf32, #tpu.memory_space<vmem>>, vector<1x8x128xf32>
    %109 = vector.shape_cast %108 : vector<1x8x128xf32> to vector<8x128xf32>
    %110 = math.log %107 : vector<8x128xf32>
    %cst_61 = arith.constant -1.000000e+02 : f32
    %111 = vector.broadcast %cst_61 : f32 to vector<8x128xf32>
    %112 = arith.maximumf %110, %111 : vector<8x128xf32>
    %cst_62 = arith.constant 1.000000e+00 : f32
    %113 = vector.broadcast %cst_62 : f32 to vector<8x128xf32>
    %114 = arith.subf %113, %107 : vector<8x128xf32>
    %115 = math.log %114 : vector<8x128xf32>
    %cst_63 = arith.constant -1.000000e+02 : f32
    %116 = vector.broadcast %cst_63 : f32 to vector<8x128xf32>
    %117 = arith.maximumf %115, %116 : vector<8x128xf32>
    %118 = arith.mulf %109, %112 : vector<8x128xf32>
    %cst_64 = arith.constant 1.000000e+00 : f32
    %119 = vector.broadcast %cst_64 : f32 to vector<8x128xf32>
    %120 = arith.subf %119, %109 : vector<8x128xf32>
    %121 = arith.mulf %120, %117 : vector<8x128xf32>
    %122 = arith.addf %118, %121 : vector<8x128xf32>
    %cst_65 = arith.constant 0.000000e+00 : f32
    %123 = vector.broadcast %cst_65 : f32 to vector<8x128xf32>
    %124 = arith.subf %123, %122 : vector<8x128xf32>
    %125 = arith.addf %105, %124 : vector<8x128xf32>
    %c7 = arith.constant 7 : index
    %c0_66 = arith.constant 0 : index
    %c0_67 = arith.constant 0 : index
    %126 = vector.load %arg2[%c7, %c0_66, %c0_67] : memref<9x8x128xf32, #tpu.memory_space<vmem>>, vector<1x8x128xf32>
    %127 = vector.shape_cast %126 : vector<1x8x128xf32> to vector<8x128xf32>
    %c7_68 = arith.constant 7 : index
    %c0_69 = arith.constant 0 : index
    %c0_70 = arith.constant 0 : index
    %128 = vector.load %arg3[%c7_68, %c0_69, %c0_70] : memref<9x8x128xf32, #tpu.memory_space<vmem>>, vector<1x8x128xf32>
    %129 = vector.shape_cast %128 : vector<1x8x128xf32> to vector<8x128xf32>
    %130 = math.log %127 : vector<8x128xf32>
    %cst_71 = arith.constant -1.000000e+02 : f32
    %131 = vector.broadcast %cst_71 : f32 to vector<8x128xf32>
    %132 = arith.maximumf %130, %131 : vector<8x128xf32>
    %cst_72 = arith.constant 1.000000e+00 : f32
    %133 = vector.broadcast %cst_72 : f32 to vector<8x128xf32>
    %134 = arith.subf %133, %127 : vector<8x128xf32>
    %135 = math.log %134 : vector<8x128xf32>
    %cst_73 = arith.constant -1.000000e+02 : f32
    %136 = vector.broadcast %cst_73 : f32 to vector<8x128xf32>
    %137 = arith.maximumf %135, %136 : vector<8x128xf32>
    %138 = arith.mulf %129, %132 : vector<8x128xf32>
    %cst_74 = arith.constant 1.000000e+00 : f32
    %139 = vector.broadcast %cst_74 : f32 to vector<8x128xf32>
    %140 = arith.subf %139, %129 : vector<8x128xf32>
    %141 = arith.mulf %140, %137 : vector<8x128xf32>
    %142 = arith.addf %138, %141 : vector<8x128xf32>
    %cst_75 = arith.constant 0.000000e+00 : f32
    %143 = vector.broadcast %cst_75 : f32 to vector<8x128xf32>
    %144 = arith.subf %143, %142 : vector<8x128xf32>
    %145 = arith.addf %125, %144 : vector<8x128xf32>
    %c8 = arith.constant 8 : index
    %c0_76 = arith.constant 0 : index
    %c0_77 = arith.constant 0 : index
    %146 = vector.load %arg2[%c8, %c0_76, %c0_77] : memref<9x8x128xf32, #tpu.memory_space<vmem>>, vector<1x8x128xf32>
    %147 = vector.shape_cast %146 : vector<1x8x128xf32> to vector<8x128xf32>
    %c8_78 = arith.constant 8 : index
    %c0_79 = arith.constant 0 : index
    %c0_80 = arith.constant 0 : index
    %148 = vector.load %arg3[%c8_78, %c0_79, %c0_80] : memref<9x8x128xf32, #tpu.memory_space<vmem>>, vector<1x8x128xf32>
    %149 = vector.shape_cast %148 : vector<1x8x128xf32> to vector<8x128xf32>
    %150 = math.log %147 : vector<8x128xf32>
    %cst_81 = arith.constant -1.000000e+02 : f32
    %151 = vector.broadcast %cst_81 : f32 to vector<8x128xf32>
    %152 = arith.maximumf %150, %151 : vector<8x128xf32>
    %cst_82 = arith.constant 1.000000e+00 : f32
    %153 = vector.broadcast %cst_82 : f32 to vector<8x128xf32>
    %154 = arith.subf %153, %147 : vector<8x128xf32>
    %155 = math.log %154 : vector<8x128xf32>
    %cst_83 = arith.constant -1.000000e+02 : f32
    %156 = vector.broadcast %cst_83 : f32 to vector<8x128xf32>
    %157 = arith.maximumf %155, %156 : vector<8x128xf32>
    %158 = arith.mulf %149, %152 : vector<8x128xf32>
    %cst_84 = arith.constant 1.000000e+00 : f32
    %159 = vector.broadcast %cst_84 : f32 to vector<8x128xf32>
    %160 = arith.subf %159, %149 : vector<8x128xf32>
    %161 = arith.mulf %160, %157 : vector<8x128xf32>
    %162 = arith.addf %158, %161 : vector<8x128xf32>
    %cst_85 = arith.constant 0.000000e+00 : f32
    %163 = vector.broadcast %cst_85 : f32 to vector<8x128xf32>
    %164 = arith.subf %163, %162 : vector<8x128xf32>
    %165 = arith.addf %145, %164 : vector<8x128xf32>
    %c0_86 = arith.constant 0 : index
    %c0_87 = arith.constant 0 : index
    %c0_88 = arith.constant 0 : index
    %166 = vector.load %arg5[%c0_86, %c0_87, %c0_88] : memref<6x8x128xf32, #tpu.memory_space<vmem>>, vector<1x8x128xf32>
    %167 = vector.shape_cast %166 : vector<1x8x128xf32> to vector<8x128xf32>
    %168 = arith.mulf %10, %67 : vector<8x128xf32>
    %169 = vector.shape_cast %168 : vector<8x128xf32> to vector<1x8x128xf32>
    %cst_89 = arith.constant dense<0.000000e+00> : vector<8x128xf32>
    %170 = vector.multi_reduction <add>, %169, %cst_89 [0] : vector<1x8x128xf32> to vector<8x128xf32>
    %171 = arith.addf %167, %170 : vector<8x128xf32>
    %c0_90 = arith.constant 0 : index
    %c0_91 = arith.constant 0 : index
    %c0_92 = arith.constant 0 : index
    %172 = vector.load %arg5[%c0_90, %c0_91, %c0_92] : memref<6x8x128xf32, #tpu.memory_space<vmem>>, vector<1x8x128xf32>
    %173 = vector.shape_cast %172 : vector<1x8x128xf32> to vector<8x128xf32>
    %174 = vector.shape_cast %171 : vector<8x128xf32> to vector<1x8x128xf32>
    tpu.vector_store %arg5[%c0_90, %c0_91, %c0_92], %174 {strides = array<i32>} : memref<6x8x128xf32, #tpu.memory_space<vmem>>, vector<1x8x128xf32>,
    %c1_93 = arith.constant 1 : index
    %c0_94 = arith.constant 0 : index
    %c0_95 = arith.constant 0 : index
    %175 = vector.load %arg5[%c1_93, %c0_94, %c0_95] : memref<6x8x128xf32, #tpu.memory_space<vmem>>, vector<1x8x128xf32>
    %176 = vector.shape_cast %175 : vector<1x8x128xf32> to vector<8x128xf32>
    %177 = arith.mulf %10, %165 : vector<8x128xf32>
    %178 = vector.shape_cast %177 : vector<8x128xf32> to vector<1x8x128xf32>
    %cst_96 = arith.constant dense<0.000000e+00> : vector<8x128xf32>
    %179 = vector.multi_reduction <add>, %178, %cst_96 [0] : vector<1x8x128xf32> to vector<8x128xf32>
    %180 = arith.addf %176, %179 : vector<8x128xf32>
    %c1_97 = arith.constant 1 : index
    %c0_98 = arith.constant 0 : index
    %c0_99 = arith.constant 0 : index
    %181 = vector.load %arg5[%c1_97, %c0_98, %c0_99] : memref<6x8x128xf32, #tpu.memory_space<vmem>>, vector<1x8x128xf32>
    %182 = vector.shape_cast %181 : vector<1x8x128xf32> to vector<8x128xf32>
    %183 = vector.shape_cast %180 : vector<8x128xf32> to vector<1x8x128xf32>
    tpu.vector_store %arg5[%c1_97, %c0_98, %c0_99], %183 {strides = array<i32>} : memref<6x8x128xf32, #tpu.memory_space<vmem>>, vector<1x8x128xf32>,
    %c2_100 = arith.constant 2 : index
    %c0_101 = arith.constant 0 : index
    %c0_102 = arith.constant 0 : index
    %184 = vector.load %arg5[%c2_100, %c0_101, %c0_102] : memref<6x8x128xf32, #tpu.memory_space<vmem>>, vector<1x8x128xf32>
    %185 = vector.shape_cast %184 : vector<1x8x128xf32> to vector<8x128xf32>
    %186 = arith.mulf %10, %84 : vector<8x128xf32>
    %187 = vector.shape_cast %186 : vector<8x128xf32> to vector<1x8x128xf32>
    %cst_103 = arith.constant dense<0.000000e+00> : vector<8x128xf32>
    %188 = vector.multi_reduction <add>, %187, %cst_103 [0] : vector<1x8x128xf32> to vector<8x128xf32>
    %189 = arith.addf %185, %188 : vector<8x128xf32>
    %c2_104 = arith.constant 2 : index
    %c0_105 = arith.constant 0 : index
    %c0_106 = arith.constant 0 : index
    %190 = vector.load %arg5[%c2_104, %c0_105, %c0_106] : memref<6x8x128xf32, #tpu.memory_space<vmem>>, vector<1x8x128xf32>
    %191 = vector.shape_cast %190 : vector<1x8x128xf32> to vector<8x128xf32>
    %192 = vector.shape_cast %189 : vector<8x128xf32> to vector<1x8x128xf32>
    tpu.vector_store %arg5[%c2_104, %c0_105, %c0_106], %192 {strides = array<i32>} : memref<6x8x128xf32, #tpu.memory_space<vmem>>, vector<1x8x128xf32>,
    %c3_107 = arith.constant 3 : index
    %c0_108 = arith.constant 0 : index
    %c0_109 = arith.constant 0 : index
    %193 = vector.load %arg5[%c3_107, %c0_108, %c0_109] : memref<6x8x128xf32, #tpu.memory_space<vmem>>, vector<1x8x128xf32>
    %194 = vector.shape_cast %193 : vector<1x8x128xf32> to vector<8x128xf32>
    %195 = arith.mulf %14, %84 : vector<8x128xf32>
    %196 = vector.shape_cast %195 : vector<8x128xf32> to vector<1x8x128xf32>
    %cst_110 = arith.constant dense<0.000000e+00> : vector<8x128xf32>
    %197 = vector.multi_reduction <add>, %196, %cst_110 [0] : vector<1x8x128xf32> to vector<8x128xf32>
    %198 = arith.addf %194, %197 : vector<8x128xf32>
    %c3_111 = arith.constant 3 : index
    %c0_112 = arith.constant 0 : index
    %c0_113 = arith.constant 0 : index
    %199 = vector.load %arg5[%c3_111, %c0_112, %c0_113] : memref<6x8x128xf32, #tpu.memory_space<vmem>>, vector<1x8x128xf32>
    %200 = vector.shape_cast %199 : vector<1x8x128xf32> to vector<8x128xf32>
    %201 = vector.shape_cast %198 : vector<8x128xf32> to vector<1x8x128xf32>
    tpu.vector_store %arg5[%c3_111, %c0_112, %c0_113], %201 {strides = array<i32>} : memref<6x8x128xf32, #tpu.memory_space<vmem>>, vector<1x8x128xf32>,
    %c4_114 = arith.constant 4 : index
    %c0_115 = arith.constant 0 : index
    %c0_116 = arith.constant 0 : index
    %202 = vector.load %arg5[%c4_114, %c0_115, %c0_116] : memref<6x8x128xf32, #tpu.memory_space<vmem>>, vector<1x8x128xf32>
    %203 = vector.shape_cast %202 : vector<1x8x128xf32> to vector<8x128xf32>
    %204 = vector.shape_cast %4 : vector<8x128xf32> to vector<1x8x128xf32>
    %cst_117 = arith.constant dense<0.000000e+00> : vector<8x128xf32>
    %205 = vector.multi_reduction <add>, %204, %cst_117 [0] : vector<1x8x128xf32> to vector<8x128xf32>
    %206 = arith.addf %203, %205 : vector<8x128xf32>
    %c4_118 = arith.constant 4 : index
    %c0_119 = arith.constant 0 : index
    %c0_120 = arith.constant 0 : index
    %207 = vector.load %arg5[%c4_118, %c0_119, %c0_120] : memref<6x8x128xf32, #tpu.memory_space<vmem>>, vector<1x8x128xf32>
    %208 = vector.shape_cast %207 : vector<1x8x128xf32> to vector<8x128xf32>
    %209 = vector.shape_cast %206 : vector<8x128xf32> to vector<1x8x128xf32>
    tpu.vector_store %arg5[%c4_118, %c0_119, %c0_120], %209 {strides = array<i32>} : memref<6x8x128xf32, #tpu.memory_space<vmem>>, vector<1x8x128xf32>,
    %c5_121 = arith.constant 5 : index
    %c0_122 = arith.constant 0 : index
    %c0_123 = arith.constant 0 : index
    %210 = vector.load %arg5[%c5_121, %c0_122, %c0_123] : memref<6x8x128xf32, #tpu.memory_space<vmem>>, vector<1x8x128xf32>
    %211 = vector.shape_cast %210 : vector<1x8x128xf32> to vector<8x128xf32>
    %212 = vector.shape_cast %6 : vector<8x128xf32> to vector<1x8x128xf32>
    %cst_124 = arith.constant dense<0.000000e+00> : vector<8x128xf32>
    %213 = vector.multi_reduction <add>, %212, %cst_124 [0] : vector<1x8x128xf32> to vector<8x128xf32>
    %214 = arith.addf %211, %213 : vector<8x128xf32>
    %c5_125 = arith.constant 5 : index
    %c0_126 = arith.constant 0 : index
    %c0_127 = arith.constant 0 : index
    %215 = vector.load %arg5[%c5_125, %c0_126, %c0_127] : memref<6x8x128xf32, #tpu.memory_space<vmem>>, vector<1x8x128xf32>
    %216 = vector.shape_cast %215 : vector<1x8x128xf32> to vector<8x128xf32>
    %217 = vector.shape_cast %214 : vector<8x128xf32> to vector<1x8x128xf32>
    tpu.vector_store %arg5[%c5_125, %c0_126, %c0_127], %217 {strides = array<i32>} : memref<6x8x128xf32, #tpu.memory_space<vmem>>, vector<1x8x128xf32>,
    return
  }
  func.func @transform_0(%arg0: i32, %arg1: i32) -> (i32, i32, i32) {
    %c1_i32 = arith.constant 1 : i32
    %0 = arith.muli %arg0, %c1_i32 : i32
    %1 = arith.addi %0, %arg1 : i32
    %c0_i32 = arith.constant 0 : i32
    %c0_i32_0 = arith.constant 0 : i32
    %c0_i32_1 = arith.constant 0 : i32
    return %c0_i32, %1, %c0_i32_0 : i32, i32, i32
  }
  func.func @transform_1(%arg0: i32, %arg1: i32) -> (i32, i32, i32) {
    %c1_i32 = arith.constant 1 : i32
    %0 = arith.muli %arg0, %c1_i32 : i32
    %1 = arith.addi %0, %arg1 : i32
    %c0_i32 = arith.constant 0 : i32
    %c0_i32_0 = arith.constant 0 : i32
    %c0_i32_1 = arith.constant 0 : i32
    return %c0_i32, %1, %c0_i32_0 : i32, i32, i32
  }
  func.func @transform_2(%arg0: i32, %arg1: i32) -> (i32, i32, i32) {
    %c1_i32 = arith.constant 1 : i32
    %0 = arith.muli %arg0, %c1_i32 : i32
    %1 = arith.addi %0, %arg1 : i32
    %c0_i32 = arith.constant 0 : i32
    %c0_i32_0 = arith.constant 0 : i32
    %c0_i32_1 = arith.constant 0 : i32
    return %c0_i32, %1, %c0_i32_0 : i32, i32, i32
  }
  func.func @transform_3(%arg0: i32, %arg1: i32) -> (i32, i32, i32) {
    %c0_i32 = arith.constant 0 : i32
    %c0_i32_0 = arith.constant 0 : i32
    %c0_i32_1 = arith.constant 0 : i32
    return %arg0, %c0_i32, %c0_i32_0 : i32, i32, i32
  }
}

</mosaic_0001>

<bundles_post_ra>
// kernel: yolov3_loss.1
= control target key start
LH: loop header
LB: loop body
LE: loop exit
PB: predicated region body
PF: predicated region fallthrough
CT: control target
= control target key end

     0   :  { %s433_s0 = inlined_call_operand.vmem [shape: f32[9,8,128], index: 0, kind: input, shape index: {}]   ;;  %s434_s2 = inlined_call_operand.vmem [shape: f32[2,8,128], index: 2, kind: input, shape index: {}]   ;;  %s435_s3 = inlined_call_operand.vmem [shape: f32[6,8,128], index: 3, kind: output, shape index: {}]   ;;  %s436_s1 = inlined_call_operand.vmem [shape: f32[9,8,128], index: 1, kind: input, shape index: {}]  }
   0x1   :  { %v84_v0 = vld [vmem:[%s433_s0] sm:$0xff]  ;;  %v269_v2 = vld [vmem:[%s433_s0 + $0x8] sm:$0xff]  ;;  %v278_v5 = vld [vmem:[%s433_s0 + $0x30] sm:$0xff] }
   0x2   :  { %295 = vlog2.f32 %v84_v0  ;;  %v89_v1 = vsub.f32 1.0, %v84_v0  ;;  %v105_v3 = vsub.f32 1.0, %v269_v2  ;;  %v276_v4 = vld [vmem:[%s433_s0 + $0x28] sm:$0xff]  ;;  %v167_v7 = vsub.f32 1.0, %v278_v5  ;;  %v280_v8 = vld [vmem:[%s433_s0 + $0x38] sm:$0xff]  ;;  %v282_v9 = vld [vmem:[%s433_s0 + $0x40] sm:$0xff] }
   0x3   :  { %297 = vlog2.f32 %v269_v2  ;;  %v150_v6 = vsub.f32 1.0, %v276_v4  ;;  %v184_v10 = vsub.f32 1.0, %v280_v8  ;;  %v365_v11 = vld [vmem:[%s434_s2] sm:$0xff]  ;;  %v373_v13 = vld [vmem:[%s434_s2 + $0x8] sm:$0xff]  ;;  %v201_v14 = vsub.f32 1.0, %v282_v9  ;;  %v271_v16 = vld [vmem:[%s433_s0 + $0x10] sm:$0xff] }
   0x4   :  { %299 = vlog2.f32 %v89_v1  ;;  %v275_v12 = vld [vmem:[%s433_s0 + $0x20] sm:$0xff]  ;;  %291 = vst [vmem:[%s435_s3 + $0x20] sm:$0xff] %v365_v11  ;;  %293 = vst [vmem:[%s435_s3 + $0x28] sm:$0xff] %v373_v13  ;;  %v272_v17 = vld [vmem:[%s436_s1 + $0x10] sm:$0xff]  ;;  %v139_v36 = vsub.f32 1.0, %v365_v11  ;;  %vm78_vm0 = vcmp.eq.f32.partialorder %v365_v11, 1.0 }
   0x5   :  { %301 = vlog2.f32 %v105_v3  ;;  %v134_v15 = vsub.f32 1.0, %v275_v12  ;;  %v273_v18 = vld [vmem:[%s433_s0 + $0x18] sm:$0xff]  ;;  %v85_v20 = vld [vmem:[%s436_s1] sm:$0xff]  ;;  %v270_v22 = vld [vmem:[%s436_s1 + $0x8] sm:$0xff]  ;;  %v119_v23 = vsub.f32 %v271_v16, %v272_v17  ;;  %vm81_vm1 = vcmp.eq.f32.partialorder %v373_v13, 1.0 }
   0x6   :  { %303 = vlog2.f32 %v276_v4  ;;  %v274_v19 = vld [vmem:[%s436_s1 + $0x18] sm:$0xff]  ;;  %v277_v27 = vld [vmem:[%s436_s1 + $0x28] sm:$0xff]  ;;  %v94_v29 = vsub.f32 1.0, %v85_v20  ;;  %v110_v34 = vsub.f32 1.0, %v270_v22  ;;  %v279_v35 = vld [vmem:[%s436_s1 + $0x30] sm:$0xff] }
   0x7   :  { %305 = vlog2.f32 %v150_v6  ;;  %v124_v26 = vsub.f32 %v273_v18, %v274_v19  ;;  %v125_v40 = vmul.f32 %v119_v23, %v119_v23  ;;  %v155_v41 = vsub.f32 1.0, %v277_v27  ;;  %v281_v42 = vld [vmem:[%s436_s1 + $0x38] sm:$0xff]  ;;  %v283_v48 = vld [vmem:[%s436_s1 + $0x40] sm:$0xff] }
   0x8   :  { %307 = vlog2.f32 %v278_v5  ;;  %v172_v53 = vsub.f32 1.0, %v279_v35  ;;  %v189_v58 = vsub.f32 1.0, %v281_v42  ;;  %v206_v63 = vsub.f32 1.0, %v283_v48 }
   0x9   :  { %309 = vlog2.f32 %v167_v7  ;;  %v127_v46 = vmul.f32 %v124_v26, %v124_v26 }
   0xa   :  { %311 = vlog2.f32 %v280_v8 }
   0xb   :  { %313 = vlog2.f32 %v184_v10 }
   0xc   :  { %315 = vlog2.f32 %v282_v9 }
   0xd   :  { %317 = vlog2.f32 %v201_v14 }
   0xe   :  { %319 = vlog2.f32 %v275_v12 }
   0xf   :  { %v296_v21 = vpop.eup %295  ;;  %321 = vlog2.f32 %v134_v15 }
  0x10   :  { %v298_v24 = vpop.eup %297  ;;  %v87_v25 = vmul.f32 0.6931472, %v296_v21 }
  0x11   :  { %v300_v28 = vpop.eup %299  ;;  %v103_v30 = vmul.f32 0.6931472, %v298_v24 }
  0x12   :  { %v302_v31 = vpop.eup %301  ;;  %v88_v32 = vmax.f32 %v87_v25, -100.0  ;;  %v91_v33 = vmul.f32 0.6931472, %v300_v28 }
  0x13   :  { %v304_v37 = vpop.eup %303  ;;  %v104_v38 = vmax.f32 %v103_v30, -100.0  ;;  %v107_v39 = vmul.f32 0.6931472, %v302_v31 }
  0x14   :  { %v306_v43 = vpop.eup %305  ;;  %v92_v44 = vmax.f32 %v91_v33, -100.0  ;;  %v93_v45 = vmul.f32 %v88_v32, %v85_v20  ;;  %v148_v47 = vmul.f32 0.6931472, %v304_v37 }
  0x15   :  { %v308_v49 = vpop.eup %307  ;;  %v108_v50 = vmax.f32 %v107_v39, -100.0  ;;  %v109_v51 = vmul.f32 %v270_v22, %v104_v38  ;;  %v152_v52 = vmul.f32 0.6931472, %v306_v43  ;;  %v323_v39 = vmov 0.0  }
  0x16   :  { %v310_v54 = vpop.eup %309  ;;  %v95_v55 = vmul.f32 %v94_v29, %v92_v44  ;;  %v149_v56 = vmax.f32 %v148_v47, -100.0  ;;  %v165_v57 = vmul.f32 0.6931472, %v308_v49 }
  0x17   :  { %v312_v59 = vpop.eup %311  ;;  %v111_v60 = vmul.f32 %v110_v34, %v108_v50  ;;  %v153_v61 = vmax.f32 %v152_v52, -100.0  ;;  %v169_v62 = vmul.f32 0.6931472, %v310_v54  ;;  %v268_v54 = vsel %vm81_vm1, 1.0, %v323_v39 }
  0x18   :  { %v314_v0 = vpop.eup %313  ;;  %v96_v1 = vadd.f32 %v95_v55, %v93_v45  ;;  %v154_v2 = vmul.f32 %v277_v27, %v149_v56  ;;  %v166_v3 = vmax.f32 %v165_v57, -100.0  ;;  %v182_v4 = vmul.f32 0.6931472, %v312_v59 }
  0x19   :  { %v316_v5 = vpop.eup %315  ;;  %v112_v6 = vadd.f32 %v111_v60, %v109_v51  ;;  %v156_v7 = vmul.f32 %v155_v41, %v153_v61  ;;  %v170_v8 = vmax.f32 %v169_v62, -100.0  ;;  %v186_v9 = vmul.f32 0.6931472, %v314_v0 }
  0x1a   :  { %v318_v10 = vpop.eup %317  ;;  %v97_v12 = vsub.f32 0.0, %v96_v1  ;;  %v171_v14 = vmul.f32 %v279_v35, %v166_v3  ;;  %v183_v15 = vmax.f32 %v182_v4, -100.0  ;;  %v199_v16 = vmul.f32 0.6931472, %v316_v5 }
  0x1b   :  { %v320_v17 = vpop.eup %319  ;;  %v113_v18 = vsub.f32 0.0, %v112_v6  ;;  %v157_v19 = vadd.f32 %v156_v7, %v154_v2  ;;  %v173_v20 = vmul.f32 %v172_v53, %v170_v8  ;;  %v187_v21 = vmax.f32 %v186_v9, -100.0 }
  0x1c   :  { %v322_v22 = vpop.eup %321  ;;  %v188_v23 = vmul.f32 %v281_v42, %v183_v15  ;;  %v200_v24 = vmax.f32 %v199_v16, -100.0  ;;  %v203_v25 = vmul.f32 0.6931472, %v318_v10  ;;  %v132_v26 = vmul.f32 0.6931472, %v320_v17 }
  0x1d   :  { %v114_v27 = vadd.f32 %v113_v18, %v97_v12  ;;  %v158_v28 = vsub.f32 0.0, %v157_v19  ;;  %v174_v29 = vadd.f32 %v173_v20, %v171_v14  ;;  %v190_v30 = vmul.f32 %v189_v58, %v187_v21 }
  0x1e   :  { %v204_v31 = vmax.f32 %v203_v25, -100.0  ;;  %v205_v32 = vmul.f32 %v283_v48, %v200_v24  ;;  %v133_v33 = vmax.f32 %v132_v26, -100.0  ;;  %v136_v34 = vmul.f32 0.6931472, %v322_v22 }
  0x1f   :  { %v126_v35 = vadd.f32 %v125_v40, %v114_v27  ;;  %v175_v37 = vsub.f32 0.0, %v174_v29  ;;  %v191_v38 = vadd.f32 %v190_v30, %v188_v23  ;;  %v267_v41 = vsel %vm78_vm0, 1.0, %v323_v39 }
  0x20   :  { %v207_v43 = vmul.f32 %v206_v63, %v204_v31  ;;  %v137_v42 = vmax.f32 %v136_v34, -100.0  ;;  %v138_v44 = vmul.f32 %v133_v33, %v365_v11 }
  0x21   :  { %v128_v45 = vadd.f32 %v127_v46, %v126_v35  ;;  %v176_v47 = vadd.f32 %v175_v37, %v158_v28  ;;  %v192_v49 = vsub.f32 0.0, %v191_v38 }
  0x22   :  { %v208_v50 = vadd.f32 %v207_v43, %v205_v32  ;;  %v140_v48 = vmul.f32 %v139_v36, %v137_v42 }
  0x23   :  { %v212_v40 = vmul.f32 %v267_v41, %v128_v45  ;;  %v193_v51 = vadd.f32 %v192_v49, %v176_v47 }
  0x24   :  { %v209_v52 = vsub.f32 0.0, %v208_v50  ;;  %v141_v53 = vadd.f32 %v140_v48, %v138_v44 }
  0x25   :  { %215 = vst [vmem:[%s435_s3] sm:$0xff] %v212_v40 }
  0x26   :  { %v210_v55 = vadd.f32 %v209_v52, %v193_v51  ;;  %v142_v56 = vsub.f32 0.0, %v141_v53 }
  0x28   :  { %v218_v46 = vmul.f32 %v267_v41, %v210_v55  ;;  %v224_v57 = vmul.f32 %v267_v41, %v142_v56  ;;  %v230_v58 = vmul.f32 %v268_v54, %v142_v56 }
  0x2a   :  { %285 = vst [vmem:[%s435_s3 + $0x8] sm:$0xff] %v218_v46  ;;  %287 = vst [vmem:[%s435_s3 + $0x10] sm:$0xff] %v224_v57 }
  0x2b   :  { %289 = vst [vmem:[%s435_s3 + $0x18] sm:$0xff] %v230_v58 }

</bundles_post_ra>
